<compile_context>
chip_gen: v5e
topology: v5e:2x2
jax: 0.10.0
libtpu: 0.0.40
codegen_flags: <defaults>
</compile_context>

<pallas_src>
import functools
import math

import numpy as np
import jax
import jax.numpy as jnp
from jax.experimental import pallas as pl
from jax.experimental.pallas import tpu as pltpu


# --------------------------------------------------------------------------------------
# Kernels
# --------------------------------------------------------------------------------------
def _fc_gate(mean_col, w1_ref, w2_ref):
    """gate = sigmoid(W2 @ relu(W1 @ mean)).  mean_col: (C, 1) f32 -> (C, 1) f32."""
    h = jnp.dot(w1_ref[...], mean_col, preferred_element_type=jnp.float32)      # (Cr, 1)
    h = jnp.maximum(h, 0.0)
    s = jnp.dot(w2_ref[...], h, preferred_element_type=jnp.float32)             # (C, 1)
    return jax.nn.sigmoid(s)


def _se_fused_kernel(x_ref, w1_ref, w2_ref, o_ref, *, inv_n, native_mul):
    """Single-pass SE for one resident image: mean + fc + sigmoid + scale.

    x_ref / o_ref: (1, C, n)   w1_ref: (Cr, C)   w2_ref: (C, Cr)
    """
    x = x_ref[0]                                                                 # (C, n)
    mean = jnp.sum(x.astype(jnp.float32), axis=1, keepdims=True) * inv_n         # (C, 1)
    gate = _fc_gate(mean, w1_ref, w2_ref)                                        # (C, 1)
    if native_mul:
        o_ref[0] = x * gate.astype(x.dtype)
    else:
        o_ref[0] = (x.astype(jnp.float32) * gate).astype(o_ref.dtype)


def _se_reduce_gate_kernel(x_ref, w1_ref, w2_ref, gate_ref, acc_ref,
                           *, inv_n, n_valid, col_tile):
    """Pass 1: per-channel spatial sum across lane tiles, fc fused into the finalize.

    x_ref:    (1, C, col_tile)  current lane tile of one image
    w1_ref:   (Cr, C)  w2_ref: (C, Cr)   resident tiny weights
    gate_ref: (1, C, 1)  output block, resident across the lane-tile axis
    acc_ref:  (C, 128)   f32 VMEM scratch (lane-chunk partial sums, pure VPU per step)
    """
    j = pl.program_id(1)

    @pl.when(j == 0)
    def _init():
        acc_ref[...] = jnp.zeros_like(acc_ref)

    x = x_ref[0].astype(jnp.float32)                                             # (C, col_tile)
    if n_valid % col_tile != 0:
        # cdiv grid: mask the out-of-bounds tail of the last (partial) tile.
        lane = jax.lax.broadcasted_iota(jnp.int32, x.shape, 1)
        valid = n_valid - j * col_tile
        x = jnp.where(lane < valid, x, 0.0)

    # Lane-chunked partial sums (VPU adds only); single cross-lane reduce at finalize.
    part = x[:, :128]
    for k in range(1, col_tile // 128):
        part = part + x[:, k * 128:(k + 1) * 128]
    acc_ref[...] += part

    @pl.when(j == pl.num_programs(1) - 1)
    def _finalize():
        mean = jnp.sum(acc_ref[...], axis=1, keepdims=True) * inv_n              # (C, 1)
        gate_ref[0] = _fc_gate(mean, w1_ref, w2_ref)


def _se_apply_kernel(x_ref, gate_ref, o_ref, *, native_mul):
    """Pass 2: out = x * gate (per-channel scale, broadcast along lanes).

    x_ref / o_ref: (1, C, col_tile)   gate_ref: (1, C, 1) f32
    """
    if native_mul:
        o_ref[...] = x_ref[...] * gate_ref[...].astype(x_ref.dtype)
    else:
        o_ref[...] = (x_ref[...].astype(jnp.float32) * gate_ref[...]).astype(o_ref.dtype)


# --------------------------------------------------------------------------------------
# Sizing helpers (generation-aware)
# --------------------------------------------------------------------------------------
def _round_up(v, m):
    return -(-v // m) * m


def _vmem_capacity_bytes():
    try:
        info = pltpu.get_tpu_info()
        cap = getattr(info, "vmem_capacity_bytes", None)
        if cap:
            return int(cap)
    except Exception:
        pass
    return 64 << 20  # conservative default (v7x per-TensorCore VMEM)


def _vmem_limit(needed_bytes, cap_bytes):
    """scoped-VMEM limit: cover what we actually use, leave headroom under the physical cap."""
    return int(min(max(needed_bytes + (4 << 20), 32 << 20), int(0.75 * cap_bytes)))


def _pick_tile(n, *, budget_bytes, bytes_per_lane):
    """Largest lane tile (multiple of 128) whose streaming buffers fit budget_bytes."""
    n_pad = _round_up(n, 128)
    t = (budget_bytes // max(bytes_per_lane, 1)) // 128 * 128
    return int(max(128, min(t, n_pad)))


# --------------------------------------------------------------------------------------
# Public forward
# --------------------------------------------------------------------------------------
def se_forward(x, w1, w2, *, force_two_pass=False, reduce_tile=None, apply_tile=None):
    """SE forward pass.

    x : (B, C, H, W)
    w1: (C//r, C)  squeezed weight of Conv2d(C, C//r, 1, bias=False)  (out_ch, in_ch)
    w2: (C, C//r)  squeezed weight of Conv2d(C//r, C, 1, bias=False)
    """
    B, C, H, W = x.shape
    Cr = w1.shape[0]
    assert w1.shape == (Cr, C) and w2.shape == (C, Cr)
    n = H * W
    x2 = x.reshape(B, C, n)                       # free view: spatial axis on lanes

    itemsize = jnp.dtype(x.dtype).itemsize
    native_mul = (x.dtype == jnp.bfloat16)        # bf16 VALU on v6e/v7x; f32 path otherwise
    sub = max(8, 32 // itemsize)                  # sublane tiling for this dtype
    C_pad = _round_up(C, sub)
    n_pad = _round_up(n, 128)
    vmem_cap = _vmem_capacity_bytes()

    img_block_bytes = C_pad * n_pad * itemsize    # one padded (1, C, n) VMEM block
    fast_bytes = 4 * img_block_bytes + (2 << 20)  # in + out, double-buffered, + weights/slop
    fast_ok = (not force_two_pass) and (fast_bytes <= int(0.65 * vmem_cap))

    if fast_ok:
        # ---- single-pass fused path: read x once, write out once ----------------------
        out2 = pl.pallas_call(
            functools.partial(_se_fused_kernel, inv_n=1.0 / n, native_mul=native_mul),
            out_shape=jax.ShapeDtypeStruct((B, C, n), x.dtype),
            grid=(B,),
            in_specs=[pl.BlockSpec((1, C, n), lambda b: (b, 0, 0)),
                      pl.BlockSpec((Cr, C), lambda b: (0, 0)),
                      pl.BlockSpec((C, Cr), lambda b: (0, 0))],
            out_specs=pl.BlockSpec((1, C, n), lambda b: (b, 0, 0)),
            compiler_params=pltpu.CompilerParams(
                dimension_semantics=("parallel",),
                vmem_limit_bytes=_vmem_limit(fast_bytes, vmem_cap)),
        )(x2, w1, w2)
        return out2.reshape(B, C, H, W)

    # ---- two-pass streaming path -------------------------------------------------------
    stream_budget = int(0.45 * vmem_cap)
    if reduce_tile is None:
        # only the x tile double-buffers in pass 1 (gate/weights/scratch are tiny)
        reduce_tile = _pick_tile(n, budget_bytes=stream_budget,
                                 bytes_per_lane=2 * C_pad * itemsize)
    if apply_tile is None:
        # pass 2 double-buffers both the x tile and the out tile
        apply_tile = _pick_tile(n, budget_bytes=stream_budget,
                                bytes_per_lane=4 * C_pad * itemsize)
    assert reduce_tile % 128 == 0 and apply_tile % 128 == 0
    nr = pl.cdiv(n, reduce_tile)
    na = pl.cdiv(n, apply_tile)

    # pass 1: tiled per-channel sum, fc + sigmoid fused into the finalize -> gate (B, C, 1)
    gate = pl.pallas_call(
        functools.partial(_se_reduce_gate_kernel, inv_n=1.0 / n,
                          n_valid=n, col_tile=reduce_tile),
        out_shape=jax.ShapeDtypeStruct((B, C, 1), jnp.float32),
        grid=(B, nr),
        in_specs=[pl.BlockSpec((1, C, reduce_tile), lambda b, j: (b, 0, j)),
                  pl.BlockSpec((Cr, C), lambda b, j: (0, 0)),
                  pl.BlockSpec((C, Cr), lambda b, j: (0, 0))],
        out_specs=pl.BlockSpec((1, C, 1), lambda b, j: (b, 0, 0)),
        scratch_shapes=[pltpu.VMEM((C, 128), jnp.float32)],
        compiler_params=pltpu.CompilerParams(
            dimension_semantics=("parallel", "arbitrary"),
            vmem_limit_bytes=_vmem_limit(2 * C_pad * reduce_tile * itemsize + (2 << 20),
                                         vmem_cap)),
    )(x2, w1, w2)

    # pass 2: out = x * gate (broadcast along lanes)
    out2 = pl.pallas_call(
        functools.partial(_se_apply_kernel, native_mul=native_mul),
        out_shape=jax.ShapeDtypeStruct((B, C, n), x.dtype),
        grid=(B, na),
        in_specs=[pl.BlockSpec((1, C, apply_tile), lambda b, j: (b, 0, j)),
                  pl.BlockSpec((1, C, 1), lambda b, j: (b, 0, 0))],
        out_specs=pl.BlockSpec((1, C, apply_tile), lambda b, j: (b, 0, j)),
        compiler_params=pltpu.CompilerParams(
            dimension_semantics=("parallel", "parallel"),
            vmem_limit_bytes=_vmem_limit(4 * C_pad * apply_tile * itemsize + (2 << 20),
                                         vmem_cap)),
    )(x2, gate)

    return out2.reshape(B, C, H, W)


# --------------------------------------------------------------------------------------
# Pure-JAX reference (mirrors SE.forward) and self-test
# --------------------------------------------------------------------------------------
def se_reference(x, w1, w2):
    mean = jnp.mean(x.astype(jnp.float32), axis=(2, 3))          # (B, C)
    h = jnp.maximum(mean @ w1.T, 0.0)                            # (B, Cr)
    gate = jax.nn.sigmoid(h @ w2.T)                              # (B, C)
    return (x * gate[:, :, None, None].astype(x.dtype)).astype(x.dtype)


if __name__ == "__main__":
    B, C, H, W = 2, 16, 16, 16
    ration = 4
    Cr = C // ration

    key = jax.random.PRNGKey(0)
    kx, k1, k2 = jax.random.split(key, 3)
    x = jax.random.normal(kx, (B, C, H, W), jnp.float32)

    # PyTorch Conv2d(nf, nf//r, 1, bias=False).weight is (nf//r, nf, 1, 1); we carry the
    # squeezed (out_ch, in_ch) matrices with PyTorch-default-ish uniform bounds.
    b1 = 1.0 / math.sqrt(C)
    b2 = 1.0 / math.sqrt(Cr)
    w1 = jax.random.uniform(k1, (Cr, C), jnp.float32, -b1, b1)
    w2 = jax.random.uniform(k2, (C, Cr), jnp.float32, -b2, b2)

    ref = jax.block_until_ready(se_reference(x, w1, w2))

    # Auto dispatch -> single-pass fused path (whole 16 KiB image resident in VMEM).
    out = jax.block_until_ready(se_forward(x, w1, w2))
    assert out.shape == (B, C, H, W)
    np.testing.assert_allclose(np.asarray(out), np.asarray(ref), rtol=2e-3, atol=2e-3)

    # Forced two-pass streaming path (H*W = 256 -> 2 lane tiles, exercises accumulation).
    out2 = jax.block_until_ready(
        se_forward(x, w1, w2, force_two_pass=True, reduce_tile=128, apply_tile=128))
    np.testing.assert_allclose(np.asarray(out2), np.asarray(ref), rtol=2e-3, atol=2e-3)

    # Forced two-pass with a partial (masked) last tile: H*W = 160 -> tiles of 128 + 32.
    xt = jax.random.normal(kx, (1, 8, 16, 10), jnp.float32)
    w1t = jax.random.uniform(k1, (2, 8), jnp.float32, -1 / math.sqrt(8), 1 / math.sqrt(8))
    w2t = jax.random.uniform(k2, (8, 2), jnp.float32, -1 / math.sqrt(2), 1 / math.sqrt(2))
    outt = jax.block_until_ready(
        se_forward(xt, w1t, w2t, force_two_pass=True, reduce_tile=128, apply_tile=128))
    np.testing.assert_allclose(np.asarray(outt), np.asarray(se_reference(xt, w1t, w2t)),
                               rtol=2e-3, atol=2e-3)

    print("KERNEL_OK")
</pallas_src>

<mosaic_0001>
module attributes {stable_mosaic.version = 11 : i64} {
  func.func @_se_fused_kernel(%arg0: i32, %arg1: memref<1x16x256xf32, #tpu.memory_space<vmem>>, %arg2: memref<4x16xf32, #tpu.memory_space<vmem>>, %arg3: memref<16x4xf32, #tpu.memory_space<vmem>>, %arg4: memref<1x16x256xf32, #tpu.memory_space<vmem>>) attributes {dimension_semantics = [#tpu.dimension_semantics<parallel>], iteration_bounds = array<i64: 2>, scalar_prefetch = 0 : i64, scratch_operands = 0 : i64, tpu.core_type = #tpu.core_type<tc>, window_params = [{transform_indices = @transform_0, window_bounds = array<i64: 1, 16, 256>}, {pipeline_mode = #tpu.pipeline_mode<synchronous>, transform_indices = @transform_1, window_bounds = array<i64: 4, 16>}, {pipeline_mode = #tpu.pipeline_mode<synchronous>, transform_indices = @transform_2, window_bounds = array<i64: 16, 4>}, {transform_indices = @transform_3, window_bounds = array<i64: 1, 16, 256>}]} {
    %c0 = arith.constant 0 : index
    %c0_0 = arith.constant 0 : index
    %c0_1 = arith.constant 0 : index
    %0 = vector.load %arg1[%c0, %c0_0, %c0_1] : memref<1x16x256xf32, #tpu.memory_space<vmem>>, vector<1x16x256xf32>
    %1 = vector.shape_cast %0 : vector<1x16x256xf32> to vector<16x256xf32>
    %cst = arith.constant dense<0.000000e+00> : vector<16xf32>
    %2 = vector.multi_reduction <add>, %1, %cst [1] : vector<16x256xf32> to vector<16xf32>
    %3 = vector.shape_cast %2 : vector<16xf32> to vector<16x1xf32>
    %cst_2 = arith.constant 3.906250e-03 : f32
    %4 = vector.broadcast %cst_2 : f32 to vector<16x1xf32>
    %5 = arith.mulf %3, %4 : vector<16x1xf32>
    %c0_3 = arith.constant 0 : index
    %c0_4 = arith.constant 0 : index
    %6 = vector.load %arg2[%c0_3, %c0_4] : memref<4x16xf32, #tpu.memory_space<vmem>>, vector<4x16xf32>
    %cst_5 = arith.constant dense<0.000000e+00> : vector<4x1xf32>
    %7 = tpu.matmul %6, %5, %cst_5 {dimension_numbers = #tpu.dot_dimension_numbers<[1], [0], [0], [1], [0, 0, 1, 1], [], []>} : vector<4x16xf32>, vector<16x1xf32>, vector<4x1xf32> -> vector<4x1xf32>
    %cst_6 = arith.constant 0.000000e+00 : f32
    %8 = vector.broadcast %cst_6 : f32 to vector<4x1xf32>
    %9 = arith.maximumf %7, %8 : vector<4x1xf32>
    %c0_7 = arith.constant 0 : index
    %c0_8 = arith.constant 0 : index
    %10 = vector.load %arg3[%c0_7, %c0_8] : memref<16x4xf32, #tpu.memory_space<vmem>>, vector<16x4xf32>
    %cst_9 = arith.constant dense<0.000000e+00> : vector<16x1xf32>
    %11 = tpu.matmul %10, %9, %cst_9 {dimension_numbers = #tpu.dot_dimension_numbers<[1], [0], [0], [1], [0, 0, 1, 1], [], []>} : vector<16x4xf32>, vector<4x1xf32>, vector<16x1xf32> -> vector<16x1xf32>
    %12 = arith.negf %11 : vector<16x1xf32>
    %13 = math.exp %12 : vector<16x1xf32>
    %cst_10 = arith.constant 1.000000e+00 : f32
    %14 = vector.broadcast %cst_10 : f32 to vector<16x1xf32>
    %15 = arith.addf %14, %13 : vector<16x1xf32>
    %16 = arith.divf %14, %15 : vector<16x1xf32>
    %17 = vector.broadcast %16 : vector<16x1xf32> to vector<16x256xf32>
    %18 = arith.mulf %1, %17 : vector<16x256xf32>
    %c0_11 = arith.constant 0 : index
    %c0_12 = arith.constant 0 : index
    %c0_13 = arith.constant 0 : index
    %19 = vector.load %arg4[%c0_11, %c0_12, %c0_13] : memref<1x16x256xf32, #tpu.memory_space<vmem>>, vector<1x16x256xf32>
    %20 = vector.shape_cast %19 : vector<1x16x256xf32> to vector<16x256xf32>
    %21 = vector.shape_cast %18 : vector<16x256xf32> to vector<1x16x256xf32>
    tpu.vector_store %arg4[%c0_11, %c0_12, %c0_13], %21 {strides = array<i32>} : memref<1x16x256xf32, #tpu.memory_space<vmem>>, vector<1x16x256xf32>,
    return
  }
  func.func @transform_0(%arg0: i32) -> (i32, i32, i32) {
    %c0_i32 = arith.constant 0 : i32
    %c0_i32_0 = arith.constant 0 : i32
    %c0_i32_1 = arith.constant 0 : i32
    return %arg0, %c0_i32, %c0_i32_0 : i32, i32, i32
  }
  func.func @transform_1(%arg0: i32) -> (i32, i32) {
    %c0_i32 = arith.constant 0 : i32
    %c0_i32_0 = arith.constant 0 : i32
    %c0_i32_1 = arith.constant 0 : i32
    return %c0_i32, %c0_i32_0 : i32, i32
  }
  func.func @transform_2(%arg0: i32) -> (i32, i32) {
    %c0_i32 = arith.constant 0 : i32
    %c0_i32_0 = arith.constant 0 : i32
    %c0_i32_1 = arith.constant 0 : i32
    return %c0_i32, %c0_i32_0 : i32, i32
  }
  func.func @transform_3(%arg0: i32) -> (i32, i32, i32) {
    %c0_i32 = arith.constant 0 : i32
    %c0_i32_0 = arith.constant 0 : i32
    %c0_i32_1 = arith.constant 0 : i32
    return %arg0, %c0_i32, %c0_i32_0 : i32, i32, i32
  }
}

</mosaic_0001>

<bundles_post_ra>
// kernel: tpu_custom_call.1
= control target key start
LH: loop header
LB: loop body
LE: loop exit
PB: predicated region body
PF: predicated region fallthrough
CT: control target
= control target key end

     0   :  { %8 = vsyncpa [#allocation3], 0  ;;  %s773_s0 = inlined_call_operand.hbm [shape: f32[2,16,256], index: 0, kind: input, shape index: {}]   ;;  %s774_s1 = inlined_call_operand.vmem [shape: f32[4,16], index: 1, kind: input, shape index: {}]   ;;  %s775_s2 = inlined_call_operand.vmem [shape: f32[16,4], index: 2, kind: input, shape index: {}]   ;;  %s776_s3 = inlined_call_operand.hbm [shape: f32[2,16,256], index: 3, kind: output, shape index: {}]  }
   0x1   :  { %10 = vsyncpa [#allocation3 + $0x1], 0 }
   0x2   :  { %11 = vsyncpa [#allocation4], 0 }
   0x3   :  { %13 = vsyncpa [#allocation4 + $0x1], 0  ;;  %s617_s12 = smov 0   ;;  %s619_s13 = smov 0  }
   0x4   :  { %s621_s14 = smov 0   ;;  %s623_s15 = smov 0  }
   0x5 LB: > { %s638_s16 = sadd.s32 4294967295, %s590_s15   ;;  %s410_s17 = sadd.s32 4294967294, %s590_s15   ;;  %s590_s15 = sphi %s623_s15, %s786_s15   ;;  %s586_s14 = sphi %s621_s14, %s785_s14   ;;  %s582_s13 = sphi %s619_s13, %s784_s13   ;;  %s578_s12 = sphi %s617_s12, %s783_s12  }
   0x6   : > { %s642_s18 = sadd.s32 1, %s590_s15   ;;  %s26_s19 = sadd.s32 1, %s586_s14 }
   0x7   : > { %s23_s20 = ssub.s32 %s590_s15, %s642_s18  ;;  %p33_p0 = scmp.ne.s32.totalorder %s586_s14, %s582_s13 }
   0x8   : > { %p24_p1 = scmp.eq.s32.totalorder %s23_s20, 0  ;;  %p34_p2 = scmp.eq.s32.totalorder %s590_s15, 0 }
   0x9   : > { %p39_p3 = scmp.ne.s32.totalorder %s582_s13, %s578_s12  ;;  %p40_p4 = scmp.eq.s32.totalorder %s638_s16, 0 }
   0xa   : > { %s654_s21 = scalar_select %p24_p1, %s586_s14, %s26_s19  }
   0xb   : > { %p656_p5 = por %p34_p2, %p33_p0  ;;  %p660_p6 = por %p40_p4, %p39_p3 }
   0xc   : > { %p105_p7 = scmp.eq.s32.totalorder %s638_s16, 1  ;;  %p111_p8 = scmp.eq.s32.totalorder %s410_s17, 1 }
   0xd   : > { %p445_p10 = scmp.lt.s32.totalorder %s590_s15, 2  ;;  %s137_s26 = sand.u32 1, %s586_s14  }
   0xe   : > { %p667_p11 = por %p105_p7, %p33_p0  ;;  %p671_p12 = por %p111_p8, %p39_p3 }
   0xf   : > { %s430_s27 = sshll.u32 %s590_s15, 5  ;;  %s413_s28 = sshll.u32 %s137_s26, 5 }
  0x10   : > { %s146_s4 = scalar_lea.hbm %s773_s0, %s430_s27  ;;  %s141_s6 = scalar_lea.vmem [#allocation2], %s413_s28 }
  0x11   : > { %s147_s5 = sshll.u32 %s146_s4, 4  ;;  %s149_s7 = sshll.u32 %s141_s6, 4  ;;  %s148_s5 = int_to_ptr.hbm [resolvable:$true] %s147_s5  ;;  %s150_s7 = int_to_ptr.vmem [resolvable:$true] %s149_s7 }
  0x12   : > { %p682_p13 = pnand %p445_p10, %p656_p5  ;;  %p416_p0 = scmp.ge.s32.totalorder %s590_s15, 1 }
  0x13   : > { %p157_p1 = scmp.lt.s32.totalorder %s590_s15, 3  ;;  %s138_s9 = scalar_lea.sflag [#allocation3], %s137_s26 }
  0x14   : > { %s494_s10 = sshra.s32 %s148_s5, 4  ;;  %p498_p3 = pneg %p682_p13  ;;  %s495_s10 = int_to_ptr.hbm [resolvable:$true] %s494_s10 }
  0x15   : > { %s496_s11 = scalar_lea.hbm %s495_s10, 32  ;;  %s501_s20 = scalar_lea.hbm %s773_s0, 64 }
  0x16   : > { %p497_p2 = scmp.ne.s32.totalorder %s495_s10, %s496_s11  ;;  %p502_p5 = scmp.lt.s32.totalorder %s495_s10, %s773_s0 }
  0x17   : > { %p503_p8 = scmp.lt.s32.totalorder %s501_s20, %s496_s11 }
  0x18   : > { %p499_p4 = pnand %p498_p3, %p497_p2 }
  0x19   : > { %p504_p10 = por %p503_p8, %p502_p5 }
  0x1a   : > { %p500_p7 = pneg %p499_p4 }
  0x1c   : > { %p505_p9 = pnand %p504_p10, %p500_p7 }
  0x1e   : > { %508 = shalt.err (!%p505_p9)
}
  0x1f   : > { %s592_s26 = smov 256   ;;  %s593_s28 = smov 16  }
  0x20   : > { %440 = dma.hbm_to_vmem [thread:$0]  (!%p682_p13), %s148_s5, 512, %s150_s7, %s138_s9, %s592_s26, %s592_s26, %s593_s28  }
  0x21   : > { %p158_p2 = pnand %p416_p0, %p157_p1 }
  0x22   : > { %s703_s29 = sand.u32 (!%p158_p2), 1, %s582_s13  }
  0x23   : > { %161 = sbr.rel (%p158_p2) target bundleno = 584 (0x248), region = 32  ;;  %s417_s30 = sshll.u32 (!%p158_p2), %s703_s29, 5 }
  0x24   : > { %s164_s4 = scalar_lea.sflag (!%p158_p2), [#allocation3], %s703_s29  ;;  %s167_s6 = scalar_lea.vmem (!%p158_p2), [#allocation2], %s417_s30 }
  0x28   : > { %569 = dma.done.wait (%p660_p6), %s164_s4, 512  }
  0x29   : > { %571 = vsyncadd (%p660_p6), %s164_s4, 4294966784  ;;  %v713_v0 = vld [vmem:[%s167_s6 + $0x10] sm:$0xff]  ;;  %v715_v1 = vld [vmem:[%s167_s6 + $0x18] sm:$0xff]  ;;  %vm204_vm0 = vcmask 130048   ;;  %vm238_vm1 = vcmask 1043456   ;;  %vm231_vm2 = vcmask 31744  }
  0x2a   : > { %v198_v2 = vadd.f32 %v715_v1, %v713_v0  ;;  %v719_v3 = vld [vmem:[%s167_s6] sm:$0xff]  ;;  %v721_v4 = vld [vmem:[%s167_s6 + $0x8] sm:$0xff]  ;;  %v594_v15 = vmov 0   ;;  %s431_s11 = sshll.u32 %s638_s16, 5  ;;  %s190_s17 = scalar_lea.vmem [#allocation5], %s417_s30 }
  0x2b   : > { %v195_v5 = vadd.f32 %v721_v4, %v719_v3  ;;  %v203_v10 = vld [vmem:[%s774_s1] sm:$0xf]  ;;  %v230_v14 = vld [vmem:[%s775_s2 + $0x8] sm:$0xff]  ;;  %484 = vset.pattern.permute.xlu1 %v594_v15  ;;  %485 = vset.pattern.permute.xlu0 %v594_v15  ;;  %s333_s22 = scalar_lea.hbm %s776_s3, %s431_s11  ;;  %s334_s27 = sshll.u32 %s190_s17, 4  ;;  %s335_s27 = int_to_ptr.vmem [resolvable:$true] %s334_s27 }
  0x2c   : > { %199 = vadd.xlane.f32.xlu0 %v198_v2  ;;  %v229_v13 = vld [vmem:[%s775_s2] sm:$0xff]  ;;  %s336_s26 = sshll.u32 %s333_s22, 4  ;;  %s322_s16 = scalar_lea.sflag [#allocation4], %s703_s29  ;;  %s337_s26 = int_to_ptr.hbm [resolvable:$true] %s336_s26 }
  0x2d   : > { %s538_s28 = sshra.s32 %s337_s26, 4  ;;  %s544_s23 = scalar_lea.hbm %s776_s3, 64  ;;  %s539_s28 = int_to_ptr.hbm [resolvable:$true] %s538_s28 }
  0x2e   : > { %s540_s30 = scalar_lea.hbm %s539_s28, 32  ;;  %p545_p0 = scmp.lt.s32.totalorder %s539_s28, %s776_s3 }
  0x2f   : > { %p541_p6 = scmp.ne.s32.totalorder %s539_s28, %s540_s30  ;;  %p546_p1 = scmp.lt.s32.totalorder %s544_s23, %s540_s30 }
  0x31   : > { %p542_p9 = pnand %p541_p6, %p667_p11  ;;  %p547_p3 = por %p546_p1, %p545_p0 }
  0x33   : > { %p543_p13 = pneg %p542_p9 }
  0x34   : > { %196 = vadd.xlane.f32.xlu0 %v195_v5 }
  0x35   : > { %p548_p4 = pnand %p547_p3, %p543_p13 }
  0x9f   : > { %v200_v6 = vpop.xlane.xlu0 %199 }
  0xa0   : > { %v202_v7 = vmul.f32 0.00390625, %v200_v6 }
  0xa2   : > { %222 = vmatpush.msra.mxu0 %v202_v7 }
  0xa7   : > { %v197_v8 = vpop.xlane.xlu0 %196 }
  0xa8   : > { %v201_v9 = vmul.f32 0.00390625, %v197_v8 }
  0xaa   : > { %223 = vmatpush.msra.mxu0 %v201_v9 }
  0xab   : > { %419 = vmatmul.msk.f32.vlgmr.msra.gmra.mxu0 %vm204_vm0, %v203_v10 }
 0x128   : > { %v225_v11 = vpop.f32.mrf.mxu0 }
 0x129   : > { %v228_v12 = vmax.f32 %v225_v11, 0.0 }
 0x12b   : > { %420 = vmatpush.msk.msra.mxu1 %vm238_vm1, %v228_v12  ;;  %432 = vmatpush.msk.msra.mxu2 %vm238_vm1, %v228_v12 }
 0x12c   : > { %421 = vmatmul.msk.f32.vlgmr.msra.gmra.mxu1 %vm231_vm2, %v229_v13  ;;  %422 = vmatmul.msk.f32.vlgmr.msra.gmra.mxu2 %vm231_vm2, %v230_v14 }
 0x1a9   : > { %v259_v16 = vpop.f32.mrf.mxu1 }
 0x1aa   : > { %v423_v17 = vmul.f32 -1.442695, %v259_v16 }
 0x1ac   : > { %486 = vpow2.f32 %v423_v17 }
 0x1af   : > { %v262_v18 = vpop.f32.mrf.mxu2 }
 0x1b0   : > { %v424_v19 = vmul.f32 -1.442695, %v262_v18 }
 0x1b2   : > { %v487_v20 = vpop.eup %486  ;;  %488 = vpow2.f32 %v424_v19 }
 0x1b3   : > { %v271_v21 = vadd.f32 1.0, %v487_v20 }
 0x1b5   : > { %490 = vrcp.f32 %v271_v21  ;;  %v284_v27 = vand.u32 2147483648, %v271_v21  ;;  %v282_v29 = vand.u32 2147483647, %v271_v21  ;;  %vm278_vm4 = vweird.f32 %v271_v21 }
 0x1b7   : > { %v285_v33 = vor.u32 1.1754944e-38, %v284_v27  ;;  %vm283_vm6 = vcmp.eq.f32.partialorder %v282_v29, 8.507059e+37 }
 0x1b8   : > { %v489_v22 = vpop.eup %488 }
 0x1b9   : > { %v272_v23 = vadd.f32 1.0, %v489_v22 }
 0x1bb   : > { %v491_v24 = vpop.eup %490  ;;  %492 = vrcp.f32 %v272_v23  ;;  %v299_v38 = vand.u32 2147483648, %v272_v23  ;;  %vm293_vm8 = vweird.f32 %v272_v23  ;;  %v297_v40 = vand.u32 2147483647, %v272_v23 }
 0x1bc   : > { %v274_v25 = vmul.f32 %v491_v24, %v271_v21  ;;  %vm279_vm3 = vweird.f32 %v491_v24 }
 0x1bd   : > { %vm280_vm5 = vmor %vm278_vm4, %vm279_vm3  ;;  %v300_v42 = vor.u32 1.1754944e-38, %v299_v38  ;;  %vm298_vm10 = vcmp.eq.f32.partialorder %v297_v40, 8.507059e+37 }
 0x1be   : > { %v275_v26 = vsub.f32 1.0, %v274_v25 }
 0x1c0   : > { %v276_v28 = vmul.f32 %v491_v24, %v275_v26 }
 0x1c1   : > { %v493_v30 = vpop.eup %492 }
 0x1c2   : > { %v277_v31 = vadd.f32 %v491_v24, %v276_v28  ;;  %v289_v32 = vmul.f32 %v493_v30, %v272_v23  ;;  %vm294_vm7 = vweird.f32 %v493_v30 }
 0x1c3   : > { %vm295_vm9 = vmor %vm293_vm8, %vm294_vm7 }
 0x1c4   : > { %v281_v34 = vsel %vm280_vm5, %v491_v24, %v277_v31  ;;  %v290_v35 = vsub.f32 1.0, %v289_v32 }
 0x1c5   : > { %v286_v36 = vsel %vm283_vm6, %v285_v33, %v281_v34 }
 0x1c6   : > { %305 = vperm.xlu1 %484, %v286_v36   ;;  %v291_v37 = vmul.f32 %v493_v30, %v290_v35 }
 0x1c8   : > { %v292_v39 = vadd.f32 %v493_v30, %v291_v37 }
 0x1ca   : > { %v296_v41 = vsel %vm295_vm9, %v493_v30, %v292_v39 }
 0x1cb   : > { %v301_v43 = vsel %vm298_vm10, %v300_v42, %v296_v41 }
 0x1ce   : > { %310 = vperm.xlu1 %484, %v301_v43  }
 0x238   : > { %v306_v44 = vpop.permute.xlu1 %305 }
 0x239   : > { %v313_v45 = vmul.f32 %v306_v44, %v719_v3  ;;  %v314_v46 = vmul.f32 %v306_v44, %v721_v4 }
 0x23b   : > { %317 = vst [vmem:[%s190_s17] sm:$0xff] %v313_v45 }
 0x23c   : > { %318 = vst [vmem:[%s190_s17 + $0x8] sm:$0xff] %v314_v46 }
 0x240   : > { %v311_v47 = vpop.permute.xlu1 %310 }
 0x241   : > { %v315_v48 = vmul.f32 %v311_v47, %v713_v0  ;;  %v316_v49 = vmul.f32 %v311_v47, %v715_v1 }
 0x243   : > { %319 = vst [vmem:[%s190_s17 + $0x10] sm:$0xff] %v315_v48 }
 0x244   : > { %320 = vst [vmem:[%s190_s17 + $0x18] sm:$0xff] %v316_v49 }
 0x245   : > { %551 = shalt.err (!%p548_p4)
}
 0x246   : > { %s595_s29 = smov 256   ;;  %s596_s8 = smov 16  }
 0x247   : > { %435 = dma.vmem_to_hbm [thread:$0]  (%p667_p11), %s335_s27, 512, %s337_s26, %s322_s16, %s595_s29, %s595_s29, %s596_s8  }
 0x248 PF: > { %s351_s9 = sand.u32 1, %s578_s12   ;;  %p782_p7 = scmp.ge.s32.totalorder %s590_s15, 2 }
 0x249   : > { %s352_s10 = scalar_lea.sflag [#allocation4], %s351_s9 }
 0x24a   : > { %p442_p5 = pnand %p782_p7, %p671_p12 }
 0x24c   : > { %p443_p8 = pneg %p442_p5 }
 0x24e   : > { %573 = dma.done.wait (%p443_p8), %s352_s10, 512  }
 0x24f   : > { %575 = vsyncadd (%p443_p8), %s352_s10, 4294966784  ;;  %p16_p10 = scmp.ge.s32.totalorder %s642_s18, 4   ;;  %s783_s12 = smov %s582_s13 }
 0x250   : > { %s784_s13 = smov %s586_s14  ;;  %s785_s14 = smov %s654_s21 }
 0x251   : > { %s786_s15 = smov %s642_s18  ;;  %18 = sbr.rel (!%p16_p10) target bundleno = 5 (0x5), region = 77 }
 0x256   :  { %358 = vsyncpa [#allocation3], 1 }
 0x257   :  { %360 = vsyncpa [#allocation3 + $0x1], 1 }
 0x258   :  { %361 = vsyncpa [#allocation4], 1 }
 0x259   :  { %363 = vsyncpa [#allocation4 + $0x1], 1 }

</bundles_post_ra>
